<compile_context>
chip_gen: v7x
topology: tpu7x:2x2x1
jax: 0.10.0
libtpu: 0.0.40
codegen_flags: <defaults>
</compile_context>

<pallas_src>
import functools

import jax
import jax.numpy as jnp
from jax.experimental import pallas as pl
from jax.experimental.pallas import tpu as pltpu


VMEM_LIMIT_BYTES = 32 * 1024 * 1024  # well above per-step footprint, safe on v5e/v6e/v7x


def _pick_tile(dim, preferred, min_steps=1):
    for t in preferred:
        if dim % t == 0 and dim // t >= min_steps:
            return t
    for t in preferred:
        if dim % t == 0:
            return t
    return dim


# ----------------------------------------------------------------------------
# Shared helper: per-cgram-type mean-pooled subword term.
#   yields  (counts_k @ cg_k) * 1/(len_k + 0.01)   as f32, shape (rows, E)
# counts are built with a short loop unrolled over the TRUE spelling length;
# padding-idx 0 hits cg row 0 (all zeros) so it contributes nothing.
# ----------------------------------------------------------------------------
def _cgram_sub_terms(sp_ref, cg_ref, slens, gpad, rows):
    iota_g = jax.lax.broadcasted_iota(jnp.int32, (1, gpad), 1)
    for k, slen in enumerate(slens):                       # ncg tiny & static -> unrolled
        sp_k = sp_ref[k]                                   # (rows, S) int32
        counts = jnp.zeros((rows, gpad), jnp.float32)
        lens = jnp.zeros((rows, 1), jnp.float32)
        for s in range(slen):                              # TRUE slen only (no pad cols)
            col = sp_k[:, s:s + 1]                         # (rows, 1)
            counts = counts + (col == iota_g).astype(jnp.float32)
            lens = lens + (col != 0).astype(jnp.float32)
        sub = jnp.dot(counts.astype(jnp.bfloat16),         # exact ints in bf16, MXU
                      cg_ref[k * gpad:(k + 1) * gpad, :],  # bf16 cgram table slice
                      preferred_element_type=jnp.float32)  # (rows, E) f32
        yield sub * (1.0 / (lens + 0.01))                  # exact f32 scale post-matmul


# ----------------------------------------------------------------------------
# Kernel 1 (output mode, fused): out = data @ (word + mean-pooled cgrams)^T
# grid = (M//tm, V//tn), both parallel; the word-table tile never touches HBM.
# ----------------------------------------------------------------------------
def _fused_output_kernel(data_ref, word_ref, sp_ref, cg_ref, out_ref, *, slens, gpad):
    tn = word_ref.shape[0]
    data_b = data_ref[...]                                 # (tm, E) bf16
    dn = (((1,), (1,)), ((), ()))                          # A @ B^T (contract E with E)
    acc = jax.lax.dot_general(data_b, word_ref[...], dn,
                              preferred_element_type=jnp.float32)        # (tm, tn)
    for sub in _cgram_sub_terms(sp_ref, cg_ref, slens, gpad, tn):
        acc = acc + jax.lax.dot_general(data_b, sub.astype(jnp.bfloat16), dn,
                                        preferred_element_type=jnp.float32)
    out_ref[...] = acc


def fused_output_matmul(data2d, word_bf16, spellings, cg_bf16, slens, *, tm=None, tn=None):
    M, E = data2d.shape
    V = word_bf16.shape[0]
    ncg, _, S = spellings.shape
    gpad = cg_bf16.shape[0] // ncg
    if tm is None:
        tm = _pick_tile(M, (128, 64, 32, 16, 8))
    if tn is None:
        # tn <= 256 keeps the (tn, gpad) counts build within the vreg file;
        # >= 2 steps keeps both v7x TensorCores fed.
        tn = _pick_tile(V, (256, 512, 128), min_steps=2)
    kernel = functools.partial(_fused_output_kernel, slens=tuple(slens), gpad=gpad)
    return pl.pallas_call(
        kernel,
        out_shape=jax.ShapeDtypeStruct((M, V), jnp.float32),
        grid=(M // tm, V // tn),
        in_specs=[
            pl.BlockSpec((tm, E), lambda i, j: (i, 0)),
            pl.BlockSpec((tn, E), lambda i, j: (j, 0)),
            pl.BlockSpec((ncg, tn, S), lambda i, j: (0, j, 0)),
            pl.BlockSpec((ncg * gpad, E), lambda i, j: (0, 0)),   # small, resident
        ],
        out_specs=pl.BlockSpec((tm, tn), lambda i, j: (i, j)),
        compiler_params=pltpu.CompilerParams(
            dimension_semantics=("parallel", "parallel"),
            vmem_limit_bytes=VMEM_LIMIT_BYTES,
        ),
    )(data2d.astype(jnp.bfloat16), word_bf16, spellings, cg_bf16)


# ----------------------------------------------------------------------------
# Kernel 2 (input mode): word embeddings for M gathered rows only.
#   out[i] = word_rows[i] + sum_k (counts_k[i] @ cg_k) / (len_k[i] + 0.01)
# ----------------------------------------------------------------------------
def _word_emb_rows_kernel(word_ref, sp_ref, cg_ref, out_ref, *, slens, gpad):
    tm = word_ref.shape[0]
    table = word_ref[...]                                  # (tm, E) f32
    for sub in _cgram_sub_terms(sp_ref, cg_ref, slens, gpad, tm):
        table = table + sub
    out_ref[...] = table


def word_emb_rows(word_rows, sp_rows, cg_bf16, slens, *, tm=None):
    Mp, E = word_rows.shape
    ncg, _, S = sp_rows.shape
    gpad = cg_bf16.shape[0] // ncg
    if tm is None:
        tm = _pick_tile(Mp, (64, 32, 16, 8), min_steps=2)  # >=2 steps when possible (v7x)
    kernel = functools.partial(_word_emb_rows_kernel, slens=tuple(slens), gpad=gpad)
    return pl.pallas_call(
        kernel,
        out_shape=jax.ShapeDtypeStruct((Mp, E), jnp.float32),
        grid=(Mp // tm,),
        in_specs=[
            pl.BlockSpec((tm, E), lambda i: (i, 0)),
            pl.BlockSpec((ncg, tm, S), lambda i: (0, i, 0)),
            pl.BlockSpec((ncg * gpad, E), lambda i: (0, 0)),
        ],
        out_specs=pl.BlockSpec((tm, E), lambda i: (i, 0)),
        compiler_params=pltpu.CompilerParams(
            dimension_semantics=("parallel",),
            vmem_limit_bytes=VMEM_LIMIT_BYTES,
        ),
    )(word_rows, sp_rows, cg_bf16)


# ----------------------------------------------------------------------------
# Module wrapper (mode='l1', param_type='l1' configuration of the PyTorch module)
# ----------------------------------------------------------------------------
class CGramTiedEncoderDecoderPallas:

    def __init__(self, key, l1_word_vocab_size, word_embedding_size,
                 l1_cgram_vocab_sizes, spelling_lens, learn_main_l1_embs=True,
                 pad_spell=8, pad_gvocab=128):
        V, E = l1_word_vocab_size, word_embedding_size
        self.V, self.E = V, E
        ncg = len(l1_cgram_vocab_sizes)
        self.spelling_lens = tuple(int(s) for s in spelling_lens)

        keys = jax.random.split(key, 2 * ncg + 1)

        # main word embedding (padding_idx=0 -> row 0 zero)
        if learn_main_l1_embs:
            w = jax.random.uniform(keys[0], (V, E), jnp.float32, -1.0, 1.0)
        else:
            w = jnp.zeros((V, E), jnp.float32)
        self.l1_word_weight = w.at[0, :].set(0.0)
        self.l1_word_weight_bf16 = self.l1_word_weight.astype(jnp.bfloat16)

        # per-cgram spelling matrices (frozen) and embedding tables
        self.spellings_raw = []
        self.cg_weights_raw = []
        sp_padded, cg_padded = [], []
        for i, (gvs, slen) in enumerate(zip(l1_cgram_vocab_sizes, spelling_lens)):
            assert gvs <= pad_gvocab and slen <= pad_spell
            sp = jax.random.randint(keys[2 * i + 1], (V, slen), 0, gvs, jnp.int32)
            sp = sp.at[0, :].set(0)    # word padding row spells to nothing
            cg = jax.random.uniform(keys[2 * i + 2], (gvs, E), jnp.float32, -1.0, 1.0)
            cg = cg.at[0, :].set(0.0)  # cgram padding_idx=0
            self.spellings_raw.append(sp)
            self.cg_weights_raw.append(cg)
            sp_padded.append(jnp.pad(sp, ((0, 0), (0, pad_spell - slen))))
            cg_padded.append(jnp.pad(cg, ((0, pad_gvocab - gvs), (0, 0))))
        self.spellings = jnp.stack(sp_padded)                 # (ncg, V, pad_spell) int32
        self.cg_concat = jnp.concatenate(cg_padded, axis=0)   # (ncg*pad_gvocab, E) f32
        self.cg_concat_bf16 = self.cg_concat.astype(jnp.bfloat16)

    @functools.partial(jax.jit, static_argnums=(0, 2))
    def forward(self, data, mode):
        # TODO(synk): nn.Dropout(0.2) is identity in eval mode; training dropout omitted.
        if mode == "input":
            B, T = data.shape
            M = B * T
            idx = jnp.clip(data.reshape(M).astype(jnp.int32), 0, self.V - 1)
            Mp = max(8, ((M + 7) // 8) * 8)
            if Mp != M:
                idx = jnp.pad(idx, (0, Mp - M))            # pad rows hit word/cg row 0
            word_rows = jnp.take(self.l1_word_weight, idx, axis=0)    # (Mp, E)
            sp_rows = jnp.take(self.spellings, idx, axis=1)           # (ncg, Mp, S)
            out = word_emb_rows(word_rows, sp_rows, self.cg_concat_bf16,
                                self.spelling_lens)
            return out[:M].reshape(B, T, self.E)
        elif mode == "output":
            B, T, E = data.shape
            M = B * T
            d2 = data.reshape(M, E)
            Mp = max(8, ((M + 7) // 8) * 8)
            if Mp != M:
                d2 = jnp.pad(d2, ((0, Mp - M), (0, 0)))
            out = fused_output_matmul(d2, self.l1_word_weight_bf16, self.spellings,
                                      self.cg_concat_bf16, self.spelling_lens)
            return out[:M].reshape(B, T, self.V)
        else:
            raise NotImplementedError("unknown mode")


# pure-JAX fp32 reference (mirrors the PyTorch code, eval-mode dropout)
def reference_forward(model, data, mode):
    acc = model.l1_word_weight
    for sp, cg in zip(model.spellings_raw, model.cg_weights_raw):
        sub = cg[sp]                                         # (V, S, E)
        lens = (sp != 0).sum(-1).astype(jnp.float32)         # (V,)
        acc = acc + sub.sum(1) / (lens[:, None] + 0.01)
    if mode == "input":
        return acc[data]
    return jnp.einsum("bte,ve->btv", data, acc)


if __name__ == "__main__":
    key = jax.random.PRNGKey(0)
    k_model, k_data_i, k_data_o = jax.random.split(key, 3)

    V, E = 1024, 128
    model = CGramTiedEncoderDecoderPallas(
        k_model,
        l1_word_vocab_size=V,
        word_embedding_size=E,
        l1_cgram_vocab_sizes=[96, 120],   # min_cgram=2 .. max_cgram=3
        spelling_lens=[5, 7],
    )

    B, T = 2, 8
    data_input = jax.random.randint(k_data_i, (B, T), 0, V, jnp.int32)
    data_output = jax.random.uniform(k_data_o, (B, T, E), jnp.float32, -1.0, 1.0)

    out_in = jax.block_until_ready(model.forward(data_input, "input"))
    out_out = jax.block_until_ready(model.forward(data_output, "output"))

    ref_in = reference_forward(model, data_input, "input")
    ref_out = reference_forward(model, data_output, "output")

    assert out_in.shape == (B, T, E) and out_out.shape == (B, T, V)

    # bf16 MXU operands -> small deviation from the fp32 reference is expected.
    err_in = float(jnp.max(jnp.abs(out_in - ref_in)))
    err_out = float(jnp.max(jnp.abs(out_out - ref_out)) / jnp.max(jnp.abs(ref_out)))
    assert err_in < 5e-2, f"input-mode max abs err {err_in}"
    assert err_out < 8e-2, f"output-mode max rel err {err_out}"

    print("KERNEL_OK")
</pallas_src>

<mosaic_0001>
module attributes {stable_mosaic.version = 11 : i64} {
  func.func @_word_emb_rows_kernel(%arg0: i32, %arg1: memref<8x128xf32, #tpu.memory_space<vmem>>, %arg2: memref<2x8x8xi32, #tpu.memory_space<vmem>>, %arg3: memref<256x128xbf16, #tpu.memory_space<vmem>>, %arg4: memref<8x128xf32, #tpu.memory_space<vmem>>) attributes {dimension_semantics = [#tpu.dimension_semantics<parallel>], iteration_bounds = array<i64: 2>, scalar_prefetch = 0 : i64, scratch_operands = 0 : i64, tpu.core_type = #tpu.core_type<tc>, window_params = [{transform_indices = @transform_0, window_bounds = array<i64: 8, 128>}, {transform_indices = @transform_1, window_bounds = array<i64: 2, 8, 8>}, {pipeline_mode = #tpu.pipeline_mode<synchronous>, transform_indices = @transform_2, window_bounds = array<i64: 256, 128>}, {transform_indices = @transform_3, window_bounds = array<i64: 8, 128>}]} {
    %c0 = arith.constant 0 : index
    %c0_0 = arith.constant 0 : index
    %0 = vector.load %arg1[%c0, %c0_0] : memref<8x128xf32, #tpu.memory_space<vmem>>, vector<8x128xf32>
    %1 = tpu.iota {dimensions = array<i32: 1>} : vector<1x128xi32>
    %c0_1 = arith.constant 0 : index
    %c0_2 = arith.constant 0 : index
    %c0_3 = arith.constant 0 : index
    %2 = vector.load %arg2[%c0_1, %c0_2, %c0_3] : memref<2x8x8xi32, #tpu.memory_space<vmem>>, vector<1x8x8xi32>
    %3 = vector.shape_cast %2 : vector<1x8x8xi32> to vector<8x8xi32>
    %cst = arith.constant 0.000000e+00 : f32
    %4 = vector.broadcast %cst : f32 to vector<8x128xf32>
    %cst_4 = arith.constant 0.000000e+00 : f32
    %5 = vector.broadcast %cst_4 : f32 to vector<8x1xf32>
    %6 = vector.extract_strided_slice %3 {offsets = [0, 0], sizes = [8, 1], strides = [1, 1]} : vector<8x8xi32> to vector<8x1xi32>
    %7 = vector.broadcast %6 : vector<8x1xi32> to vector<8x128xi32>
    %8 = vector.broadcast %1 : vector<1x128xi32> to vector<8x128xi32>
    %9 = arith.cmpi eq, %7, %8 : vector<8x128xi32>
    %10 = arith.extui %9 : vector<8x128xi1> to vector<8x128xi32>
    %11 = arith.sitofp %10 : vector<8x128xi32> to vector<8x128xf32>
    %12 = arith.addf %4, %11 : vector<8x128xf32>
    %c0_i32 = arith.constant 0 : i32
    %13 = vector.broadcast %c0_i32 : i32 to vector<8x1xi32>
    %14 = arith.cmpi ne, %6, %13 : vector<8x1xi32>
    %15 = arith.extui %14 : vector<8x1xi1> to vector<8x1xi32>
    %16 = arith.sitofp %15 : vector<8x1xi32> to vector<8x1xf32>
    %17 = arith.addf %5, %16 : vector<8x1xf32>
    %18 = vector.extract_strided_slice %3 {offsets = [0, 1], sizes = [8, 1], strides = [1, 1]} : vector<8x8xi32> to vector<8x1xi32>
    %19 = vector.broadcast %18 : vector<8x1xi32> to vector<8x128xi32>
    %20 = vector.broadcast %1 : vector<1x128xi32> to vector<8x128xi32>
    %21 = arith.cmpi eq, %19, %20 : vector<8x128xi32>
    %22 = arith.extui %21 : vector<8x128xi1> to vector<8x128xi32>
    %23 = arith.sitofp %22 : vector<8x128xi32> to vector<8x128xf32>
    %24 = arith.addf %12, %23 : vector<8x128xf32>
    %c0_i32_5 = arith.constant 0 : i32
    %25 = vector.broadcast %c0_i32_5 : i32 to vector<8x1xi32>
    %26 = arith.cmpi ne, %18, %25 : vector<8x1xi32>
    %27 = arith.extui %26 : vector<8x1xi1> to vector<8x1xi32>
    %28 = arith.sitofp %27 : vector<8x1xi32> to vector<8x1xf32>
    %29 = arith.addf %17, %28 : vector<8x1xf32>
    %30 = vector.extract_strided_slice %3 {offsets = [0, 2], sizes = [8, 1], strides = [1, 1]} : vector<8x8xi32> to vector<8x1xi32>
    %31 = vector.broadcast %30 : vector<8x1xi32> to vector<8x128xi32>
    %32 = vector.broadcast %1 : vector<1x128xi32> to vector<8x128xi32>
    %33 = arith.cmpi eq, %31, %32 : vector<8x128xi32>
    %34 = arith.extui %33 : vector<8x128xi1> to vector<8x128xi32>
    %35 = arith.sitofp %34 : vector<8x128xi32> to vector<8x128xf32>
    %36 = arith.addf %24, %35 : vector<8x128xf32>
    %c0_i32_6 = arith.constant 0 : i32
    %37 = vector.broadcast %c0_i32_6 : i32 to vector<8x1xi32>
    %38 = arith.cmpi ne, %30, %37 : vector<8x1xi32>
    %39 = arith.extui %38 : vector<8x1xi1> to vector<8x1xi32>
    %40 = arith.sitofp %39 : vector<8x1xi32> to vector<8x1xf32>
    %41 = arith.addf %29, %40 : vector<8x1xf32>
    %42 = vector.extract_strided_slice %3 {offsets = [0, 3], sizes = [8, 1], strides = [1, 1]} : vector<8x8xi32> to vector<8x1xi32>
    %43 = vector.broadcast %42 : vector<8x1xi32> to vector<8x128xi32>
    %44 = vector.broadcast %1 : vector<1x128xi32> to vector<8x128xi32>
    %45 = arith.cmpi eq, %43, %44 : vector<8x128xi32>
    %46 = arith.extui %45 : vector<8x128xi1> to vector<8x128xi32>
    %47 = arith.sitofp %46 : vector<8x128xi32> to vector<8x128xf32>
    %48 = arith.addf %36, %47 : vector<8x128xf32>
    %c0_i32_7 = arith.constant 0 : i32
    %49 = vector.broadcast %c0_i32_7 : i32 to vector<8x1xi32>
    %50 = arith.cmpi ne, %42, %49 : vector<8x1xi32>
    %51 = arith.extui %50 : vector<8x1xi1> to vector<8x1xi32>
    %52 = arith.sitofp %51 : vector<8x1xi32> to vector<8x1xf32>
    %53 = arith.addf %41, %52 : vector<8x1xf32>
    %54 = vector.extract_strided_slice %3 {offsets = [0, 4], sizes = [8, 1], strides = [1, 1]} : vector<8x8xi32> to vector<8x1xi32>
    %55 = vector.broadcast %54 : vector<8x1xi32> to vector<8x128xi32>
    %56 = vector.broadcast %1 : vector<1x128xi32> to vector<8x128xi32>
    %57 = arith.cmpi eq, %55, %56 : vector<8x128xi32>
    %58 = arith.extui %57 : vector<8x128xi1> to vector<8x128xi32>
    %59 = arith.sitofp %58 : vector<8x128xi32> to vector<8x128xf32>
    %60 = arith.addf %48, %59 : vector<8x128xf32>
    %c0_i32_8 = arith.constant 0 : i32
    %61 = vector.broadcast %c0_i32_8 : i32 to vector<8x1xi32>
    %62 = arith.cmpi ne, %54, %61 : vector<8x1xi32>
    %63 = arith.extui %62 : vector<8x1xi1> to vector<8x1xi32>
    %64 = arith.sitofp %63 : vector<8x1xi32> to vector<8x1xf32>
    %65 = arith.addf %53, %64 : vector<8x1xf32>
    %66 = arith.truncf %60 : vector<8x128xf32> to vector<8x128xbf16>
    %c0_9 = arith.constant 0 : index
    %c0_10 = arith.constant 0 : index
    %67 = vector.load %arg3[%c0_9, %c0_10] : memref<256x128xbf16, #tpu.memory_space<vmem>>, vector<128x128xbf16>
    %cst_11 = arith.constant dense<0.000000e+00> : vector<8x128xf32>
    %68 = tpu.matmul %66, %67, %cst_11 {dimension_numbers = #tpu.dot_dimension_numbers<[1], [0], [0], [1], [0, 0, 1, 1], [], []>} : vector<8x128xbf16>, vector<128x128xbf16>, vector<8x128xf32> -> vector<8x128xf32>
    %cst_12 = arith.constant 0.00999999977 : f32
    %69 = vector.broadcast %cst_12 : f32 to vector<8x1xf32>
    %70 = arith.addf %65, %69 : vector<8x1xf32>
    %cst_13 = arith.constant 1.000000e+00 : f32
    %71 = vector.broadcast %cst_13 : f32 to vector<8x1xf32>
    %72 = arith.divf %71, %70 : vector<8x1xf32>
    %73 = vector.broadcast %72 : vector<8x1xf32> to vector<8x128xf32>
    %74 = arith.mulf %68, %73 : vector<8x128xf32>
    %75 = arith.addf %0, %74 : vector<8x128xf32>
    %c1 = arith.constant 1 : index
    %c0_14 = arith.constant 0 : index
    %c0_15 = arith.constant 0 : index
    %76 = vector.load %arg2[%c1, %c0_14, %c0_15] : memref<2x8x8xi32, #tpu.memory_space<vmem>>, vector<1x8x8xi32>
    %77 = vector.shape_cast %76 : vector<1x8x8xi32> to vector<8x8xi32>
    %cst_16 = arith.constant 0.000000e+00 : f32
    %78 = vector.broadcast %cst_16 : f32 to vector<8x128xf32>
    %cst_17 = arith.constant 0.000000e+00 : f32
    %79 = vector.broadcast %cst_17 : f32 to vector<8x1xf32>
    %80 = vector.extract_strided_slice %77 {offsets = [0, 0], sizes = [8, 1], strides = [1, 1]} : vector<8x8xi32> to vector<8x1xi32>
    %81 = vector.broadcast %80 : vector<8x1xi32> to vector<8x128xi32>
    %82 = vector.broadcast %1 : vector<1x128xi32> to vector<8x128xi32>
    %83 = arith.cmpi eq, %81, %82 : vector<8x128xi32>
    %84 = arith.extui %83 : vector<8x128xi1> to vector<8x128xi32>
    %85 = arith.sitofp %84 : vector<8x128xi32> to vector<8x128xf32>
    %86 = arith.addf %78, %85 : vector<8x128xf32>
    %c0_i32_18 = arith.constant 0 : i32
    %87 = vector.broadcast %c0_i32_18 : i32 to vector<8x1xi32>
    %88 = arith.cmpi ne, %80, %87 : vector<8x1xi32>
    %89 = arith.extui %88 : vector<8x1xi1> to vector<8x1xi32>
    %90 = arith.sitofp %89 : vector<8x1xi32> to vector<8x1xf32>
    %91 = arith.addf %79, %90 : vector<8x1xf32>
    %92 = vector.extract_strided_slice %77 {offsets = [0, 1], sizes = [8, 1], strides = [1, 1]} : vector<8x8xi32> to vector<8x1xi32>
    %93 = vector.broadcast %92 : vector<8x1xi32> to vector<8x128xi32>
    %94 = vector.broadcast %1 : vector<1x128xi32> to vector<8x128xi32>
    %95 = arith.cmpi eq, %93, %94 : vector<8x128xi32>
    %96 = arith.extui %95 : vector<8x128xi1> to vector<8x128xi32>
    %97 = arith.sitofp %96 : vector<8x128xi32> to vector<8x128xf32>
    %98 = arith.addf %86, %97 : vector<8x128xf32>
    %c0_i32_19 = arith.constant 0 : i32
    %99 = vector.broadcast %c0_i32_19 : i32 to vector<8x1xi32>
    %100 = arith.cmpi ne, %92, %99 : vector<8x1xi32>
    %101 = arith.extui %100 : vector<8x1xi1> to vector<8x1xi32>
    %102 = arith.sitofp %101 : vector<8x1xi32> to vector<8x1xf32>
    %103 = arith.addf %91, %102 : vector<8x1xf32>
    %104 = vector.extract_strided_slice %77 {offsets = [0, 2], sizes = [8, 1], strides = [1, 1]} : vector<8x8xi32> to vector<8x1xi32>
    %105 = vector.broadcast %104 : vector<8x1xi32> to vector<8x128xi32>
    %106 = vector.broadcast %1 : vector<1x128xi32> to vector<8x128xi32>
    %107 = arith.cmpi eq, %105, %106 : vector<8x128xi32>
    %108 = arith.extui %107 : vector<8x128xi1> to vector<8x128xi32>
    %109 = arith.sitofp %108 : vector<8x128xi32> to vector<8x128xf32>
    %110 = arith.addf %98, %109 : vector<8x128xf32>
    %c0_i32_20 = arith.constant 0 : i32
    %111 = vector.broadcast %c0_i32_20 : i32 to vector<8x1xi32>
    %112 = arith.cmpi ne, %104, %111 : vector<8x1xi32>
    %113 = arith.extui %112 : vector<8x1xi1> to vector<8x1xi32>
    %114 = arith.sitofp %113 : vector<8x1xi32> to vector<8x1xf32>
    %115 = arith.addf %103, %114 : vector<8x1xf32>
    %116 = vector.extract_strided_slice %77 {offsets = [0, 3], sizes = [8, 1], strides = [1, 1]} : vector<8x8xi32> to vector<8x1xi32>
    %117 = vector.broadcast %116 : vector<8x1xi32> to vector<8x128xi32>
    %118 = vector.broadcast %1 : vector<1x128xi32> to vector<8x128xi32>
    %119 = arith.cmpi eq, %117, %118 : vector<8x128xi32>
    %120 = arith.extui %119 : vector<8x128xi1> to vector<8x128xi32>
    %121 = arith.sitofp %120 : vector<8x128xi32> to vector<8x128xf32>
    %122 = arith.addf %110, %121 : vector<8x128xf32>
    %c0_i32_21 = arith.constant 0 : i32
    %123 = vector.broadcast %c0_i32_21 : i32 to vector<8x1xi32>
    %124 = arith.cmpi ne, %116, %123 : vector<8x1xi32>
    %125 = arith.extui %124 : vector<8x1xi1> to vector<8x1xi32>
    %126 = arith.sitofp %125 : vector<8x1xi32> to vector<8x1xf32>
    %127 = arith.addf %115, %126 : vector<8x1xf32>
    %128 = vector.extract_strided_slice %77 {offsets = [0, 4], sizes = [8, 1], strides = [1, 1]} : vector<8x8xi32> to vector<8x1xi32>
    %129 = vector.broadcast %128 : vector<8x1xi32> to vector<8x128xi32>
    %130 = vector.broadcast %1 : vector<1x128xi32> to vector<8x128xi32>
    %131 = arith.cmpi eq, %129, %130 : vector<8x128xi32>
    %132 = arith.extui %131 : vector<8x128xi1> to vector<8x128xi32>
    %133 = arith.sitofp %132 : vector<8x128xi32> to vector<8x128xf32>
    %134 = arith.addf %122, %133 : vector<8x128xf32>
    %c0_i32_22 = arith.constant 0 : i32
    %135 = vector.broadcast %c0_i32_22 : i32 to vector<8x1xi32>
    %136 = arith.cmpi ne, %128, %135 : vector<8x1xi32>
    %137 = arith.extui %136 : vector<8x1xi1> to vector<8x1xi32>
    %138 = arith.sitofp %137 : vector<8x1xi32> to vector<8x1xf32>
    %139 = arith.addf %127, %138 : vector<8x1xf32>
    %140 = vector.extract_strided_slice %77 {offsets = [0, 5], sizes = [8, 1], strides = [1, 1]} : vector<8x8xi32> to vector<8x1xi32>
    %141 = vector.broadcast %140 : vector<8x1xi32> to vector<8x128xi32>
    %142 = vector.broadcast %1 : vector<1x128xi32> to vector<8x128xi32>
    %143 = arith.cmpi eq, %141, %142 : vector<8x128xi32>
    %144 = arith.extui %143 : vector<8x128xi1> to vector<8x128xi32>
    %145 = arith.sitofp %144 : vector<8x128xi32> to vector<8x128xf32>
    %146 = arith.addf %134, %145 : vector<8x128xf32>
    %c0_i32_23 = arith.constant 0 : i32
    %147 = vector.broadcast %c0_i32_23 : i32 to vector<8x1xi32>
    %148 = arith.cmpi ne, %140, %147 : vector<8x1xi32>
    %149 = arith.extui %148 : vector<8x1xi1> to vector<8x1xi32>
    %150 = arith.sitofp %149 : vector<8x1xi32> to vector<8x1xf32>
    %151 = arith.addf %139, %150 : vector<8x1xf32>
    %152 = vector.extract_strided_slice %77 {offsets = [0, 6], sizes = [8, 1], strides = [1, 1]} : vector<8x8xi32> to vector<8x1xi32>
    %153 = vector.broadcast %152 : vector<8x1xi32> to vector<8x128xi32>
    %154 = vector.broadcast %1 : vector<1x128xi32> to vector<8x128xi32>
    %155 = arith.cmpi eq, %153, %154 : vector<8x128xi32>
    %156 = arith.extui %155 : vector<8x128xi1> to vector<8x128xi32>
    %157 = arith.sitofp %156 : vector<8x128xi32> to vector<8x128xf32>
    %158 = arith.addf %146, %157 : vector<8x128xf32>
    %c0_i32_24 = arith.constant 0 : i32
    %159 = vector.broadcast %c0_i32_24 : i32 to vector<8x1xi32>
    %160 = arith.cmpi ne, %152, %159 : vector<8x1xi32>
    %161 = arith.extui %160 : vector<8x1xi1> to vector<8x1xi32>
    %162 = arith.sitofp %161 : vector<8x1xi32> to vector<8x1xf32>
    %163 = arith.addf %151, %162 : vector<8x1xf32>
    %164 = arith.truncf %158 : vector<8x128xf32> to vector<8x128xbf16>
    %c128 = arith.constant 128 : index
    %c0_25 = arith.constant 0 : index
    %165 = vector.load %arg3[%c128, %c0_25] : memref<256x128xbf16, #tpu.memory_space<vmem>>, vector<128x128xbf16>
    %cst_26 = arith.constant dense<0.000000e+00> : vector<8x128xf32>
    %166 = tpu.matmul %164, %165, %cst_26 {dimension_numbers = #tpu.dot_dimension_numbers<[1], [0], [0], [1], [0, 0, 1, 1], [], []>} : vector<8x128xbf16>, vector<128x128xbf16>, vector<8x128xf32> -> vector<8x128xf32>
    %cst_27 = arith.constant 0.00999999977 : f32
    %167 = vector.broadcast %cst_27 : f32 to vector<8x1xf32>
    %168 = arith.addf %163, %167 : vector<8x1xf32>
    %cst_28 = arith.constant 1.000000e+00 : f32
    %169 = vector.broadcast %cst_28 : f32 to vector<8x1xf32>
    %170 = arith.divf %169, %168 : vector<8x1xf32>
    %171 = vector.broadcast %170 : vector<8x1xf32> to vector<8x128xf32>
    %172 = arith.mulf %166, %171 : vector<8x128xf32>
    %173 = arith.addf %75, %172 : vector<8x128xf32>
    %c0_29 = arith.constant 0 : index
    %c0_30 = arith.constant 0 : index
    %174 = vector.load %arg4[%c0_29, %c0_30] : memref<8x128xf32, #tpu.memory_space<vmem>>, vector<8x128xf32>
    tpu.vector_store %arg4[%c0_29, %c0_30], %173 {strides = array<i32>} : memref<8x128xf32, #tpu.memory_space<vmem>>, vector<8x128xf32>,
    return
  }
  func.func @transform_0(%arg0: i32) -> (i32, i32) {
    %c0_i32 = arith.constant 0 : i32
    %c0_i32_0 = arith.constant 0 : i32
    return %arg0, %c0_i32 : i32, i32
  }
  func.func @transform_1(%arg0: i32) -> (i32, i32, i32) {
    %c0_i32 = arith.constant 0 : i32
    %c0_i32_0 = arith.constant 0 : i32
    %c0_i32_1 = arith.constant 0 : i32
    return %c0_i32, %arg0, %c0_i32_0 : i32, i32, i32
  }
  func.func @transform_2(%arg0: i32) -> (i32, i32) {
    %c0_i32 = arith.constant 0 : i32
    %c0_i32_0 = arith.constant 0 : i32
    %c0_i32_1 = arith.constant 0 : i32
    return %c0_i32, %c0_i32_0 : i32, i32
  }
  func.func @transform_3(%arg0: i32) -> (i32, i32) {
    %c0_i32 = arith.constant 0 : i32
    %c0_i32_0 = arith.constant 0 : i32
    return %arg0, %c0_i32 : i32, i32
  }
}

</mosaic_0001>

<bundles_post_ra>
// kernel: forward.1
= control target key start
LH: loop header
LB: loop body
LE: loop exit
PB: predicated region body
PF: predicated region fallthrough
CT: control target
= control target key end

     0   :  { %8 = vsyncpa [#allocation4], 0  ;;  %s1223_s0 = inlined_call_operand.vmem [shape: f32[16,128], index: 0, kind: input, shape index: {}]   ;;  %s1224_s1 = inlined_call_operand.vmem [shape: s32[2,16,8], index: 1, kind: input, shape index: {}]   ;;  %s1225_s2 = inlined_call_operand.vmem [shape: bf16[256,128], index: 2, kind: input, shape index: {}]   ;;  %s1226_s3 = inlined_call_operand.hbm [shape: f32[16,128], index: 3, kind: output, shape index: {}]  }
   0x1   :  { %10 = vsyncpa [#allocation4 + $0x1], 0  ;;  %s1004_s12 = smov 0   ;;  %s1006_s13 = smov 0  }
   0x2   :  { %s1008_s14 = smov 0   ;;  %s1010_s15 = smov 0  }
   0x3 LB: > { %s1025_s16 = sadd.s32 4294967295, %s966_s15   ;;  %s687_s17 = sadd.s32 4294967294, %s966_s15   ;;  %s966_s15 = sphi %s1010_s15, %s1232_s15   ;;  %s962_s14 = sphi %s1008_s14, %s1231_s14   ;;  %s958_s13 = sphi %s1006_s13, %s1230_s13   ;;  %s954_s12 = sphi %s1004_s12, %s1229_s12  }
   0x4   : > { %s1029_s18 = sadd.s32 1, %s966_s15   ;;  %s49_s19 = sadd.s32 1, %s962_s14 }
   0x5   : > { %s46_s20 = ssub.s32 %s966_s15, %s1029_s18  ;;  %p56_p0 = scmp.ne.s32.totalorder %s962_s14, %s958_s13 }
   0x6   : > { %p47_p1 = scmp.eq.s32.totalorder %s46_s20, 0  ;;  %p57_p2 = scmp.eq.s32.totalorder %s966_s15, 0 }
   0x7   : > { %p107_p3 = scmp.eq.s32.totalorder %s1025_s16, 1  ;;  %p112_p4 = scmp.ne.s32.totalorder %s958_s13, %s954_s12 }
   0x8   : > { %s1041_s21 = scalar_select %p47_p1, %s962_s14, %s49_s19  }
   0x9   : > { %p58_p5 = por %p57_p2, %p56_p0  ;;  %p1043_p6 = por %p107_p3, %p56_p0 }
   0xa   : > { %p113_p7 = scmp.eq.s32.totalorder %s687_s17, 1  ;;  %p689_p9 = scmp.ge.s32.totalorder %s966_s15, 2 }
   0xc   : > { %p1047_p8 = por %p113_p7, %p112_p4  ;;  %132 = sbr.rel (%p689_p9) target bundleno = 26 (0x1a), region = 20 }
  0x13   : > { %142 = sbr.rel (!%p58_p5) target bundleno = 26 (0x1a), region = 28  ;;  %s144_s24 = sand.u32 (%p58_p5), 1, %s962_s14  }
  0x14   : > { %s691_s25 = sshll.u32 (%p58_p5), %s966_s15, 3  ;;  %s690_s26 = sshll.u32 (%p58_p5), %s144_s24, 4 }
  0x15   : > { %s148_s29 = scalar_lea.vmem (%p58_p5), %s1224_s1, %s691_s25  ;;  %s146_s30 = scalar_lea.vmem (%p58_p5), [#allocation2], %s690_s26 }
  0x16   : > { %v178_v0 = vld [vmem:[%s148_s29] sm:$0xff] (%p58_p5)  ;;  %v180_v1 = vld [vmem:[%s148_s29 + $0x10] sm:$0xff] (%p58_p5) }
  0x17   : > { %179 = vst [vmem:[%s146_s30] sm:$0xff] (%p58_p5), %v178_v0  ;;  %181 = vst [vmem:[%s146_s30 + $0x8] sm:$0xff] (%p58_p5), %v180_v1 }
  0x1a PF: > { %p692_p10 = scmp.ge.s32.totalorder %s966_s15, 1  ;;  %p186_p11 = scmp.lt.s32.totalorder %s966_s15, 3 }
  0x1c   : > { %p187_p12 = pnand %p692_p10, %p186_p11 }
  0x1d   : > { %s1062_s4 = sand.u32 (!%p187_p12), 1, %s958_s13   ;;  %v968_v2 = vmov (!%p187_p12), 0   ;;  %v969_v3 = vmov (!%p187_p12), 0.0   ;;  %v876_v6 = vld [vmem:[%s1225_s2] sm:$0xff] (!%p187_p12)   ;;  %v877_v7 = vld [vmem:[%s1225_s2 + $0x8] sm:$0xff] (!%p187_p12)   ;;  %v970_v8 = vmov (!%p187_p12), 1   ;;  %v226_v34 = vlaneseq (!%p187_p12) }
  0x1e   : > { %190 = sbr.rel (%p187_p12) target bundleno = 428 (0x1ac), region = 66  ;;  %845 = vset.pattern.permute.xlu1 (!%p187_p12), %v968_v2  ;;  %843 = vset.pattern.permute.xlu0 (!%p187_p12), %v968_v2  ;;  %s693_s5 = sshll.u32 (!%p187_p12), %s1062_s4, 4  ;;  %v878_v9 = vld [vmem:[%s1225_s2 + $0x40] sm:$0xff] (!%p187_p12)   ;;  %v879_v10 = vld [vmem:[%s1225_s2 + $0x10] sm:$0xff] (!%p187_p12)   ;;  %v880_v11 = vld [vmem:[%s1225_s2 + $0x48] sm:$0xff] (!%p187_p12)   ;;  %v971_v12 = vmov (!%p187_p12), 2  }
  0x1f   : > { %749 = vmatprep.subr.bf16.mxu0 (!%p187_p12), %v969_v3  ;;  %769 = vmatprep.subr.bf16.mxu1 (!%p187_p12), %v969_v3  ;;  %s195_s6 = scalar_lea.vmem (!%p187_p12), [#allocation2], %s693_s5  ;;  %v881_v13 = vld [vmem:[%s1225_s2 + $0x18] sm:$0xff] (!%p187_p12)   ;;  %v882_v14 = vld [vmem:[%s1225_s2 + $0x50] sm:$0xff] (!%p187_p12)   ;;  %v972_v15 = vmov (!%p187_p12), 3   ;;  %v973_v16 = vmov (!%p187_p12), 4   ;;  %v883_v17 = vld [vmem:[%s1225_s2 + $0x20] sm:$0xff] (!%p187_p12)  }
  0x20   : > { %v1069_v4 = vld [vmem:[%s195_s6 + $0x8] sm:$0xff] (!%p187_p12)  ;;  %v228_v5 = vld [vmem:[%s195_s6] sm:$0xff] (!%p187_p12)  ;;  %750 = vmatpush3.bf16.msra.mxu0 (!%p187_p12), %v876_v6  ;;  %770 = vmatpush3.bf16.msra.mxu1 (!%p187_p12), %v878_v9  ;;  %v974_v19 = vmov (!%p187_p12), 6   ;;  %s975_s17 = smov (!%p187_p12), 125   ;;  %v976_v27 = vmov (!%p187_p12), 5   ;;  %s977_s26 = smov (!%p187_p12), 123  }
  0x21   : > { %403 = vperm.xlu0 (!%p187_p12), %843, %v1069_v4   ;;  %230 = vperm.xlu1 (!%p187_p12), %845, %v228_v5   ;;  %vm236_vm0 = vcmp.ne.s32.totalorder (!%p187_p12), %v228_v5, 0  ;;  %vm409_vm1 = vcmp.ne.s32.totalorder (!%p187_p12), %v1069_v4, 0  ;;  %v884_v18 = vld [vmem:[%s1225_s2 + $0x58] sm:$0xff] (!%p187_p12)   ;;  %v885_v23 = vld [vmem:[%s1225_s2 + $0x28] sm:$0xff] (!%p187_p12)   ;;  %v886_v24 = vld [vmem:[%s1225_s2 + $0x60] sm:$0xff] (!%p187_p12)   ;;  %vm978_vm2 = vmmov (!%p187_p12), 0  }
  0x22   : > { %751 = vmatprep.subr.bf16.mxu0 (!%p187_p12), %v969_v3  ;;  %771 = vmatprep.subr.bf16.mxu1 (!%p187_p12), %v969_v3  ;;  %v1112_v20 = vsel (!%p187_p12), %vm236_vm0, 1.0, %v969_v3  ;;  %v1115_v21 = vsel (!%p187_p12), %vm409_vm1, 1.0, %v969_v3  ;;  %v887_v25 = vld [vmem:[%s1225_s2 + $0x30] sm:$0xff] (!%p187_p12)   ;;  %v888_v26 = vld [vmem:[%s1225_s2 + $0x68] sm:$0xff] (!%p187_p12)   ;;  %v889_v28 = vld [vmem:[%s1225_s2 + $0x38] sm:$0xff] (!%p187_p12)   ;;  %s979_s5 = smov (!%p187_p12), 127  }
  0x23   : > { %v864_v22 = vpack.i.bf16 (!%p187_p12), %v1112_v20, %v1115_v21  ;;  %v890_v29 = vld [vmem:[%s1225_s2 + $0x70] sm:$0xff] (!%p187_p12)   ;;  %765 = vmatprep.mubr.msk.bf16.mxu0 (!%p187_p12), %vm978_vm2, %v969_v3  ;;  %785 = vmatprep.mubr.msk.bf16.mxu1 (!%p187_p12), %vm978_vm2, %v969_v3  ;;  %v891_v30 = vld [vmem:[%s1225_s2 + $0x78] sm:$0xff] (!%p187_p12)   ;;  %s980_s8 = smov (!%p187_p12), 126   ;;  %s981_s9 = smov (!%p187_p12), 124   ;;  %v227_v37 = vand.u32 (!%p187_p12), 127, %v226_v34 }
  0x24   : > { %752 = vmatpush3.bf16.msra.mxu0 (!%p187_p12), %v877_v7  ;;  %772 = vmatpush3.bf16.msra.mxu1 (!%p187_p12), %v880_v11  ;;  %s982_s10 = smov (!%p187_p12), 122   ;;  %p220_p13 = scmp.lt.s32.totalorder (!%p187_p12), %s1025_s16, 1 }
  0x25   : > { %844 = vset.pattern.permute.xlu0 %v970_v8  ;;  %846 = vset.pattern.permute.xlu1 %v970_v8  ;;  %s694_s19 = sshll.u32 %s1062_s4, 3  ;;  %s983_s7 = smov [#allocation3]  }
  0x26   : > { %414 = vperm.xlu0 %844, %v1069_v4   ;;  %241 = vperm.xlu1 %846, %v228_v5   ;;  %s221_s11 = scalar_select %p220_p13, %s1025_s16, 1 }
  0x27   : > { %753 = vmatprep.subr.bf16.mxu0 %v969_v3  ;;  %773 = vmatprep.subr.bf16.mxu1 %v969_v3  ;;  %s219_s27 = scalar_lea.vmem [#allocation3], %s694_s19 }
  0x28   : > { %754 = vmatpush3.bf16.msra.mxu0 %v879_v10  ;;  %774 = vmatpush3.bf16.msra.mxu1 %v882_v14  ;;  %s610_s28 = sshll.u32 %s219_s27, 4  ;;  %s1181_s28 = int_to_ptr.vmem [resolvable:$true] %s610_s28 }
  0x29   : > { %755 = vmatprep.subr.bf16.mxu0 %v969_v3  ;;  %775 = vmatprep.subr.bf16.mxu1 %v969_v3  ;;  %s904_s6 = scalar_lea.vmem %s1181_s28, 128 }
  0x2a   : > { %848 = vset.pattern.permute.xlu0 %v971_v12  ;;  %847 = vset.pattern.permute.xlu1 %v971_v12  ;;  %p905_p0 = scmp.ne.s32.totalorder %s1181_s28, %s904_s6 }
  0x2b   : > { %253 = vperm.xlu0 %848, %v228_v5   ;;  %426 = vperm.xlu1 %847, %v1069_v4  }
  0x2c   : > { %756 = vmatpush3.bf16.msra.mxu0 %v881_v13  ;;  %776 = vmatpush3.bf16.msra.mxu1 %v884_v18  ;;  %p906_p1 = pnand %p905_p0, %p1043_p6 }
  0x2d   : > { %757 = vmatprep.subr.bf16.mxu0 %v969_v3  ;;  %777 = vmatprep.subr.bf16.mxu1 %v969_v3 }
  0x2e   : > { %p907_p2 = pneg %p906_p1 }
  0x2f   : > { %849 = vset.pattern.permute.xlu1 %v972_v15  ;;  %850 = vset.pattern.permute.xlu0 %v973_v16 }
  0x30   : > { %437 = vperm.xlu1 %849, %v1069_v4   ;;  %448 = vperm.xlu0 %850, %v1069_v4  }
  0x31   : > { %758 = vmatpush3.bf16.msra.mxu0 %v883_v17  ;;  %778 = vmatpush3.bf16.msra.mxu1 %v886_v24 }
  0x32   : > { %759 = vmatprep.subr.bf16.mxu0 %v969_v3  ;;  %779 = vmatprep.subr.bf16.mxu1 %v969_v3 }
  0x34   : > { %264 = vperm.xlu1 %849, %v228_v5   ;;  %853 = vset.pattern.permute.xlu0 %v974_v19 }
  0x35   : > { %470 = vperm.xlu0 %853, %v1069_v4   ;;  %760 = vmatpush3.bf16.msra.mxu0 %v885_v23 }
  0x36   : > { %761 = vmatprep.subr.bf16.mxu0 %v969_v3  ;;  %780 = vmatpush3.bf16.msra.mxu1 %v888_v26 }
  0x37   : > { %781 = vmatprep.subr.bf16.mxu1 %v969_v3 }
  0x38   : > { %851 = vset.pattern.permute.xlu1 %v973_v16 }
  0x39   : > { %275 = vperm.xlu1 %851, %v228_v5   ;;  %865 = vrot.lane.b32.xlu0 %v864_v22, %s975_s17  ;;  %s695_s17 = sshll.u32 %s221_s11, 3 }
  0x3a   : > { %874 = vset.pattern.permute.xlu0 %v968_v2  ;;  %762 = vmatpush3.bf16.msra.mxu0 %v887_v25  ;;  %s223_s25 = scalar_lea.vmem %s1223_s0, %s695_s17 }
  0x3b   : > { %763 = vmatprep.subr.bf16.mxu0 %v969_v3  ;;  %782 = vmatpush3.bf16.msra.mxu1 %v890_v29 }
  0x3c   : > { %783 = vmatprep.subr.bf16.mxu1 %v969_v3 }
  0x3d   : > { %852 = vset.pattern.permute.xlu1 %v976_v27  ;;  %465 = vrot.lane.b32.xlu0 %v1115_v21, %s977_s26  ;;  %s728_s26 = sshll.u32 %s1025_s16, 7  ;;  %s597_s16 = scalar_lea.sflag [#allocation4], %s1062_s4 }
  0x3e   : > { %459 = vperm.xlu1 %852, %v1069_v4   ;;  %764 = vmatpush3.bf16.msra.mxu0 %v889_v28 }
  0x3f   : > { %784 = vmatpush3.bf16.msra.mxu1 %v891_v30 }
  0x42   : > { %855 = vrot.lane.b32.xlu1 %v864_v22, %s979_s5  ;;  %s1179_s5 = scalar_lea.hbm %s1226_s3, %s728_s26 }
  0x43   : > { %875 = vset.pattern.permute.xlu1 %v968_v2 }
  0x46   : > { %860 = vrot.lane.b32.xlu1 %v864_v22, %s980_s8  ;;  %s908_s8 = sshll.u32 %s983_s7, 4  ;;  %s909_s8 = int_to_ptr.vmem [resolvable:$false] %s908_s8 }
  0x47   : > { %p911_p3 = scmp.lt.s32.totalorder %s1181_s28, %s909_s8 }
  0x4a   : > { %870 = vrot.lane.b32.xlu1 %v864_v22, %s981_s9  ;;  %s910_s9 = scalar_lea.vmem %s909_s8, 256 }
  0x4b   : > { %p912_p4 = scmp.lt.s32.totalorder %s910_s9, %s904_s6 }
  0x4d   : > { %p913_p5 = por %p912_p4, %p911_p3 }
  0x4e   : > { %476 = vrot.lane.b32.xlu1 %v1115_v21, %s982_s10 }
  0x4f   : > { %p914_p7 = pnand %p913_p5, %p907_p2 }
  0xa0   : > { %v231_v31 = vpop.permute.xlu1 %230  ;;  %v404_v32 = vpop.permute.xlu0 %403 }
  0xa1   : > { %vm405_vm3 = vcmp.eq.s32.totalorder %v404_v32, %v227_v37  ;;  %vm232_vm6 = vcmp.eq.s32.totalorder %v231_v31, %v227_v37  ;;  %v225_v31 = vld [vmem:[%s223_s25] sm:$0xff] }
  0xa2   : > { %v711_v40 = vsel %vm405_vm3, 1.0, %v969_v3  ;;  %v696_v43 = vsel %vm232_vm6, 1.0, %v969_v3 }
  0xa5   : > { %v242_v33 = vpop.permute.xlu1 %241  ;;  %v415_v35 = vpop.permute.xlu0 %414 }
  0xa6   : > { %vm416_vm4 = vcmp.eq.s32.totalorder %v415_v35, %v227_v37  ;;  %vm243_vm5 = vcmp.eq.s32.totalorder %v242_v33, %v227_v37 }
  0xa7   : > { %v713_v41 = vsel %vm416_vm4, 1.0, %v969_v3  ;;  %v698_v42 = vsel %vm243_vm5, 1.0, %v969_v3 }
  0xa8   : > { %v419_v45 = vadd.f32 %v713_v41, %v711_v40  ;;  %v246_v47 = vadd.f32 %v698_v42, %v696_v43 }
  0xaa   : > { %v427_v36 = vpop.permute.xlu1 %426  ;;  %v254_v38 = vpop.permute.xlu0 %253 }
  0xab   : > { %vm255_vm7 = vcmp.eq.s32.totalorder %v254_v38, %v227_v37  ;;  %vm428_vm8 = vcmp.eq.s32.totalorder %v427_v36, %v227_v37 }
  0xac   : > { %v699_v46 = vsel %vm255_vm7, 1.0, %v969_v3  ;;  %v714_v48 = vsel %vm428_vm8, 1.0, %v969_v3 }
  0xad   : > { %v258_v51 = vadd.f32 %v699_v46, %v246_v47  ;;  %v431_v53 = vadd.f32 %v714_v48, %v419_v45 }
  0xaf   : > { %v438_v39 = vpop.permute.xlu1 %437  ;;  %v449_v49 = vpop.permute.xlu0 %448 }
  0xb0   : > { %vm439_vm9 = vcmp.eq.s32.totalorder %v438_v39, %v227_v37  ;;  %vm450_vm11 = vcmp.eq.s32.totalorder %v449_v49, %v227_v37 }
  0xb1   : > { %v715_v52 = vsel %vm439_vm9, 1.0, %v969_v3  ;;  %v716_v59 = vsel %vm450_vm11, 1.0, %v969_v3 }
  0xb2   : > { %v442_v57 = vadd.f32 %v715_v52, %v431_v53 }
  0xb3   : > { %v265_v44 = vpop.permute.xlu1 %264 }
  0xb4   : > { %vm266_vm10 = vcmp.eq.s32.totalorder %v265_v44, %v227_v37  ;;  %v471_v56 = vpop.permute.xlu0 %470  ;;  %v453_v63 = vadd.f32 %v716_v59, %v442_v57 }
  0xb5   : > { %v700_v50 = vsel %vm266_vm10, 1.0, %v969_v3  ;;  %vm472_vm13 = vcmp.eq.s32.totalorder %v471_v56, %v227_v37 }
  0xb6   : > { %v269_v55 = vadd.f32 %v700_v50, %v258_v51  ;;  %v718_v1 = vsel %vm472_vm13, 1.0, %v969_v3 }
  0xb8   : > { %v276_v54 = vpop.permute.xlu1 %275  ;;  %v866_v6 = vpop.permute.xlu0 %865 }
  0xb9   : > { %vm277_vm12 = vcmp.eq.s32.totalorder %v276_v54, %v227_v37 }
  0xba   : > { %v701_v58 = vsel %vm277_vm12, 1.0, %v969_v3 }
  0xbb   : > { %v280_v60 = vadd.f32 %v701_v58, %v269_v55 }
  0xbd   : > { %v285_v61 = vpack.c.bf16 %v280_v60, %v280_v60  ;;  %v460_v62 = vpop.permute.xlu1 %459 }
  0xbe   : > { %vm461_vm14 = vcmp.eq.s32.totalorder %v460_v62, %v227_v37 }
  0xbf   : > { %v717_v0 = vsel %vm461_vm14, 1.0, %v969_v3  ;;  %766 = vmatmul.mubr.bf16.vlgmr.msra.gmra.mrb[0].mxu0 %v285_v61  ;;  %v466_v3 = vpop.permute.xlu0 %465 }
  0xc0   : > { %v464_v2 = vadd.f32 %v717_v0, %v453_v63 }
  0xc1   : > { %v856_v4 = vpop.permute.xlu1 %855 }
  0xc2   : > { %v475_v5 = vadd.f32 %v718_v1, %v464_v2  ;;  %v896_v8 = vadd.high.f32.bf16 %v1112_v20, %v856_v4  ;;  %v897_v9 = vadd.low.f32.bf16 %v1115_v21, %v856_v4 }
  0xc4   : > { %v480_v7 = vpack.c.bf16 %v475_v5, %v475_v5 }
  0xc5   : > { %v861_v10 = vpop.permute.xlu1 %860 }
  0xc6   : > { %786 = vmatmul.mubr.bf16.vlgmr.msra.gmra.mrb[0].mxu1 %v480_v7  ;;  %v898_v11 = vadd.high.f32.bf16 %v896_v8, %v861_v10  ;;  %v899_v12 = vadd.low.f32.bf16 %v897_v9, %v861_v10 }
  0xc8   : > { %v900_v14 = vadd.high.f32.bf16 %v898_v11, %v866_v6  ;;  %v901_v15 = vadd.low.f32.bf16 %v899_v12, %v866_v6 }
  0xc9   : > { %v871_v13 = vpop.permute.xlu1 %870 }
  0xca   : > { %v902_v16 = vadd.high.f32.bf16 %v900_v14, %v871_v13  ;;  %v903_v17 = vadd.low.f32.bf16 %v901_v15, %v871_v13 }
  0xcc   : > { %v390_v19 = vadd.f32 0.01, %v902_v16  ;;  %v468_v22 = vadd.f32 %v903_v17, %v466_v3 }
  0xcd   : > { %v477_v18 = vpop.permute.xlu1 %476 }
  0xce   : > { %892 = vrcp.f32 %v390_v19  ;;  %v479_v20 = vadd.f32 %v477_v18, %v468_v22 }
  0xd0   : > { %v585_v23 = vadd.f32 0.01, %v479_v20 }
  0xd2   : > { %894 = vrcp.f32 %v585_v23 }
  0xd8   : > { %v893_v21 = vpop.eup %892 }
  0xd9   : > { %395 = vperm.xlu0 %874, %v893_v21  }
  0xdc   : > { %v895_v24 = vpop.eup %894 }
  0xdd   : > { %590 = vperm.xlu1 %875, %v895_v24  }
 0x158   : > { %v396_v26 = vpop.permute.xlu0 %395 }
 0x15c   : > { %v591_v32 = vpop.permute.xlu1 %590 }
 0x192   : > { %v384_v25 = vpop.f32.mrb[0].mxu0 }
 0x193   : > { %v767_v27 = vpop.f32.mrb[1].mxu0  ;;  %v398_v30 = vmul.f32 %v396_v26, %v384_v25 }
 0x194   : > { %v387_v28 = vpop.f32.mrb[2].mxu0 }
 0x195   : > { %v768_v29 = vpop.f32.mrb[3].mxu0  ;;  %v399_v34 = vadd.f32 %v398_v30, %v225_v31 }
 0x199   : > { %v579_v33 = vpop.f32.mrb[0].mxu1 }
 0x19a   : > { %v593_v35 = vmul.f32 %v591_v32, %v579_v33  ;;  %v787_v36 = vpop.f32.mrb[1].mxu1 }
 0x19b   : > { %v582_v37 = vpop.f32.mrb[2].mxu1 }
 0x19c   : > { %v594_v38 = vadd.f32 %v593_v35, %v399_v34  ;;  %v788_v39 = vpop.f32.mrb[3].mxu1 }
 0x19e   : > { %595 = vst [vmem:[%s219_s27] sm:$0xff] %v594_v38 }
 0x19f   : > { %917 = shalt.err (!%p914_p7)
}
 0x1a0   : > { %s918_s4 = scalar_lea.hbm %s1179_s5, 128  ;;  %s922_s17 = scalar_lea.hbm %s1226_s3, 256 }
 0x1a1   : > { %p919_p10 = scmp.ne.s32.totalorder %s1179_s5, %s918_s4  ;;  %p923_p13 = scmp.lt.u32.totalorder %s1179_s5, %s1226_s3 }
 0x1a2   : > { %p924_p0 = scmp.lt.u32.totalorder %s922_s17, %s918_s4  ;;  %p926_p2 = scmp.lt.u32.totalorder %s918_s4, %s1179_s5 }
 0x1a3   : > { %p920_p11 = pnand %p919_p10, %p1043_p6 }
 0x1a4   : > { %p925_p1 = por %p924_p0, %p923_p13 }
 0x1a5   : > { %p921_p12 = pneg %p920_p11 }
 0x1a6   : > { %p927_p3 = por %p926_p2, %p925_p1 }
 0x1a8   : > { %p928_p4 = pnand %p927_p3, %p921_p12 }
 0x1aa   : > { %931 = shalt.err (!%p928_p4)
}
 0x1ab   : > { %789 = dma.vmem_to_hbm [thread:$0]  (%p1043_p6), %s1181_s28, 128, %s1179_s5, %s597_s16  }
 0x1ac PF: > { %s622_s24 = sand.u32 1, %s954_s12   ;;  %p792_p5 = pnand %p689_p9, %p1047_p8 }
 0x1ad   : > { %s623_s25 = scalar_lea.sflag [#allocation4], %s622_s24 }
 0x1ae   : > { %949 = dma.done.wait (!%p792_p5), %s623_s25, 128  }
 0x1af   : > { %951 = vsyncadd (!%p792_p5), %s623_s25, 4294967168  ;;  %p13_p7 = scmp.ge.s32.totalorder %s1029_s18, 4   ;;  %s1229_s12 = smov %s958_s13 }
 0x1b0   : > { %s1230_s13 = smov %s962_s14  ;;  %s1231_s14 = smov %s1041_s21 }
 0x1b1   : > { %s1232_s15 = smov %s1029_s18  ;;  %15 = sbr.rel (!%p13_p7) target bundleno = 3 (0x3), region = 114 }
 0x1b8   :  { %628 = vsyncpa [#allocation4], 1 }
 0x1b9   :  { %630 = vsyncpa [#allocation4 + $0x1], 1 }

</bundles_post_ra>
